<compile_context>
chip_gen: v6e
topology: v6e:2x2x1
jax: 0.10.0
libtpu: 0.0.40
codegen_flags: <defaults>
</compile_context>

<pallas_src>
import functools

import jax
import jax.numpy as jnp
from jax.experimental import pallas as pl
from jax.experimental.pallas import tpu as pltpu

_LANE = 128            # vreg lane width
_MAX_BATCH_TILE = 256  # cap on the batch tile (multiple of 8 and 16)


def _round_up(x, m):
    return (x + m - 1) // m * m


def _sublane_pack(dtype):
    # bf16 packs 2 rows per sublane -> second-to-last dim must be mult of 16.
    return 16 if dtype == jnp.bfloat16 else 8


def _fused_mlp_kernel(x_ref, w_ref, b_ref, o_ref, *, num_layers, compute_dtype):
    """Whole MLP forward on one VMEM-resident batch tile.

    x_ref: (TM, D)     zero-padded activations (compute_dtype)
    w_ref: (L, D, D)   zero-padded weights, stacked (compute_dtype)
    b_ref: (L, 1, D)   zero-padded biases, stacked (f32)
    o_ref: (TM, D)     zero-padded output (f32)

    tanh on all layers except the last; intermediates never leave vregs.
    """
    h = x_ref[...]
    y = None
    for i in range(num_layers):              # statically unrolled (L is tiny)
        # MXU matmul with f32 accumulation regardless of compute dtype.
        y = jnp.dot(h, w_ref[i], preferred_element_type=jnp.float32)
        # (1, D) bias broadcasts over the batch sublanes; add happens in f32.
        y = y + b_ref[i]
        if i < num_layers - 1:
            # tanh in f32 (v5e EUP has no bf16 path), cast back for next dot.
            h = jnp.tanh(y).astype(compute_dtype)
    o_ref[...] = y.astype(o_ref.dtype)


def prepare_net(params, compute_dtype=jnp.bfloat16):
    """One-time prep: zero-pad + stack weights/biases into lane-dense slabs.

    Returns ((w_stack, b_stack), meta); pass the result to net_forward.
    """
    num_layers = len(params)
    d_in = params[0][0].shape[0]
    dims = [d_in] + [w.shape[1] for (w, _) in params]
    # Common lane-dense padded width for every layer (all dims <= 128 here).
    # TODO(synk): for much wider nets, tile K/N per layer instead of padding
    # every layer to one common D slab.
    D = _round_up(max(dims), _LANE)

    w_stack = jnp.zeros((num_layers, D, D), compute_dtype)
    b_stack = jnp.zeros((num_layers, 1, D), jnp.float32)
    for i, (w, b) in enumerate(params):
        k, n = w.shape
        w_stack = w_stack.at[i, :k, :n].set(w.astype(compute_dtype))
        b_stack = b_stack.at[i, 0, :n].set(b.astype(jnp.float32))

    meta = {"d_out": dims[-1]}
    return (w_stack, b_stack), meta


@functools.partial(jax.jit, static_argnums=(3,))
def _forward_jit(w_stack, b_stack, x, d_out):
    compute_dtype = w_stack.dtype
    num_layers, D, _ = w_stack.shape
    M, d_in = x.shape

    pack = _sublane_pack(compute_dtype)
    TM = min(_round_up(M, pack), _MAX_BATCH_TILE)   # capped batch tile
    M_pad = _round_up(M, TM)
    grid = (M_pad // TM,)

    # Pad x to (M_pad, D); padded lanes/rows are zero and sliced off below.
    x_pad = jnp.zeros((M_pad, D), compute_dtype).at[:M, :d_in].set(
        x.astype(compute_dtype))

    kernel = functools.partial(
        _fused_mlp_kernel, num_layers=num_layers, compute_dtype=compute_dtype)

    out_pad = pl.pallas_call(
        kernel,
        out_shape=jax.ShapeDtypeStruct((M_pad, D), jnp.float32),
        grid=grid,
        in_specs=[
            pl.BlockSpec((TM, D), lambda i: (i, 0)),                # x tile
            pl.BlockSpec((num_layers, D, D), lambda i: (0, 0, 0)),  # weights (resident)
            pl.BlockSpec((num_layers, 1, D), lambda i: (0, 0, 0)),  # biases (resident)
        ],
        out_specs=pl.BlockSpec((TM, D), lambda i: (i, 0)),
        compiler_params=pltpu.CompilerParams(
            dimension_semantics=("parallel",)),   # shards batch tiles on v7x megacore
    )(x_pad, w_stack, b_stack)

    return out_pad[:M, :d_out]


def net_forward(prepared, x):
    """Mirror of Net.forward: tanh on all layers except the last, fully fused."""
    (w_stack, b_stack), meta = prepared
    return _forward_jit(w_stack, b_stack, x, meta["d_out"])


def init_params(key, layer_sizes):
    """Xavier-normal weights (gain=1), zero biases, like the torch module."""
    params = []
    for i in range(len(layer_sizes) - 1):
        fan_in, fan_out = layer_sizes[i], layer_sizes[i + 1]
        key, sub = jax.random.split(key)
        std = (2.0 / (fan_in + fan_out)) ** 0.5
        w = std * jax.random.normal(sub, (fan_in, fan_out), dtype=jnp.float32)
        b = jnp.zeros((fan_out,), dtype=jnp.float32)
        params.append((w, b))
    return params


def _reference(params, x):
    h = x
    for i, (w, b) in enumerate(params):
        h = h @ w + b
        if i < len(params) - 1:
            h = jnp.tanh(h)
    return h


if __name__ == "__main__":
    layer_sizes = [32, 64, 64, 16]   # small synthetic MLP
    batch = 8

    key = jax.random.PRNGKey(0)
    pkey, xkey = jax.random.split(key)
    params = init_params(pkey, layer_sizes)
    x = jax.random.normal(xkey, (batch, layer_sizes[0]), dtype=jnp.float32)
    ref = _reference(params, x)

    # f32 path: bit-tight correctness check against the plain-JAX reference.
    prep_f32 = prepare_net(params, compute_dtype=jnp.float32)
    out_f32 = jax.block_until_ready(net_forward(prep_f32, x))
    assert out_f32.shape == (batch, layer_sizes[-1]), out_f32.shape
    assert jnp.allclose(out_f32, ref, atol=1e-5, rtol=1e-5)

    # bf16 path (default, perf-recommended on v6e/v7x): looser tolerance.
    prep_bf16 = prepare_net(params)   # bfloat16 weights/activations, f32 accum
    out_bf16 = jax.block_until_ready(net_forward(prep_bf16, x))
    assert out_bf16.shape == (batch, layer_sizes[-1]), out_bf16.shape
    assert jnp.allclose(out_bf16, ref, atol=5e-2, rtol=5e-2)

    # Larger batch: exercises the capped TM (256), multi-step parallel grid,
    # and padded-batch-row slicing.
    x_big = jax.random.normal(jax.random.PRNGKey(1), (300, layer_sizes[0]),
                              dtype=jnp.float32)
    ref_big = _reference(params, x_big)
    out_big = jax.block_until_ready(net_forward(prep_f32, x_big))
    assert out_big.shape == (300, layer_sizes[-1]), out_big.shape
    assert jnp.allclose(out_big, ref_big, atol=1e-5, rtol=1e-5)

    print("KERNEL_OK")
</pallas_src>

<mosaic_0001>
module attributes {stable_mosaic.version = 11 : i64} {
  func.func @_fused_mlp_kernel(%arg0: i32, %arg1: memref<8x128xf32, #tpu.memory_space<vmem>>, %arg2: memref<3x128x128xf32, #tpu.memory_space<vmem>>, %arg3: memref<3x1x128xf32, #tpu.memory_space<vmem>>, %arg4: memref<8x128xf32, #tpu.memory_space<vmem>>) attributes {dimension_semantics = [#tpu.dimension_semantics<parallel>], iteration_bounds = array<i64: 1>, scalar_prefetch = 0 : i64, scratch_operands = 0 : i64, tpu.core_type = #tpu.core_type<tc>, window_params = [{transform_indices = @transform_0, window_bounds = array<i64: 8, 128>}, {pipeline_mode = #tpu.pipeline_mode<synchronous>, transform_indices = @transform_1, window_bounds = array<i64: 3, 128, 128>}, {pipeline_mode = #tpu.pipeline_mode<synchronous>, transform_indices = @transform_2, window_bounds = array<i64: 3, 1, 128>}, {transform_indices = @transform_3, window_bounds = array<i64: 8, 128>}]} {
    %c0 = arith.constant 0 : index
    %c0_0 = arith.constant 0 : index
    %0 = vector.load %arg1[%c0, %c0_0] : memref<8x128xf32, #tpu.memory_space<vmem>>, vector<8x128xf32>
    %c0_1 = arith.constant 0 : index
    %c0_2 = arith.constant 0 : index
    %c0_3 = arith.constant 0 : index
    %1 = vector.load %arg2[%c0_1, %c0_2, %c0_3] : memref<3x128x128xf32, #tpu.memory_space<vmem>>, vector<1x128x128xf32>
    %2 = vector.shape_cast %1 : vector<1x128x128xf32> to vector<128x128xf32>
    %cst = arith.constant dense<0.000000e+00> : vector<8x128xf32>
    %3 = tpu.matmul %0, %2, %cst {dimension_numbers = #tpu.dot_dimension_numbers<[1], [0], [0], [1], [0, 0, 1, 1], [], []>} : vector<8x128xf32>, vector<128x128xf32>, vector<8x128xf32> -> vector<8x128xf32>
    %c0_4 = arith.constant 0 : index
    %c0_5 = arith.constant 0 : index
    %c0_6 = arith.constant 0 : index
    %4 = vector.load %arg3[%c0_4, %c0_5, %c0_6] : memref<3x1x128xf32, #tpu.memory_space<vmem>>, vector<1x1x128xf32>
    %5 = vector.shape_cast %4 : vector<1x1x128xf32> to vector<1x128xf32>
    %6 = vector.broadcast %5 : vector<1x128xf32> to vector<8x128xf32>
    %7 = arith.addf %3, %6 : vector<8x128xf32>
    %8 = math.tanh %7 : vector<8x128xf32>
    %c1 = arith.constant 1 : index
    %c0_7 = arith.constant 0 : index
    %c0_8 = arith.constant 0 : index
    %9 = vector.load %arg2[%c1, %c0_7, %c0_8] : memref<3x128x128xf32, #tpu.memory_space<vmem>>, vector<1x128x128xf32>
    %10 = vector.shape_cast %9 : vector<1x128x128xf32> to vector<128x128xf32>
    %cst_9 = arith.constant dense<0.000000e+00> : vector<8x128xf32>
    %11 = tpu.matmul %8, %10, %cst_9 {dimension_numbers = #tpu.dot_dimension_numbers<[1], [0], [0], [1], [0, 0, 1, 1], [], []>} : vector<8x128xf32>, vector<128x128xf32>, vector<8x128xf32> -> vector<8x128xf32>
    %c1_10 = arith.constant 1 : index
    %c0_11 = arith.constant 0 : index
    %c0_12 = arith.constant 0 : index
    %12 = vector.load %arg3[%c1_10, %c0_11, %c0_12] : memref<3x1x128xf32, #tpu.memory_space<vmem>>, vector<1x1x128xf32>
    %13 = vector.shape_cast %12 : vector<1x1x128xf32> to vector<1x128xf32>
    %14 = vector.broadcast %13 : vector<1x128xf32> to vector<8x128xf32>
    %15 = arith.addf %11, %14 : vector<8x128xf32>
    %16 = math.tanh %15 : vector<8x128xf32>
    %c2 = arith.constant 2 : index
    %c0_13 = arith.constant 0 : index
    %c0_14 = arith.constant 0 : index
    %17 = vector.load %arg2[%c2, %c0_13, %c0_14] : memref<3x128x128xf32, #tpu.memory_space<vmem>>, vector<1x128x128xf32>
    %18 = vector.shape_cast %17 : vector<1x128x128xf32> to vector<128x128xf32>
    %cst_15 = arith.constant dense<0.000000e+00> : vector<8x128xf32>
    %19 = tpu.matmul %16, %18, %cst_15 {dimension_numbers = #tpu.dot_dimension_numbers<[1], [0], [0], [1], [0, 0, 1, 1], [], []>} : vector<8x128xf32>, vector<128x128xf32>, vector<8x128xf32> -> vector<8x128xf32>
    %c2_16 = arith.constant 2 : index
    %c0_17 = arith.constant 0 : index
    %c0_18 = arith.constant 0 : index
    %20 = vector.load %arg3[%c2_16, %c0_17, %c0_18] : memref<3x1x128xf32, #tpu.memory_space<vmem>>, vector<1x1x128xf32>
    %21 = vector.shape_cast %20 : vector<1x1x128xf32> to vector<1x128xf32>
    %22 = vector.broadcast %21 : vector<1x128xf32> to vector<8x128xf32>
    %23 = arith.addf %19, %22 : vector<8x128xf32>
    %c0_19 = arith.constant 0 : index
    %c0_20 = arith.constant 0 : index
    %24 = vector.load %arg4[%c0_19, %c0_20] : memref<8x128xf32, #tpu.memory_space<vmem>>, vector<8x128xf32>
    tpu.vector_store %arg4[%c0_19, %c0_20], %23 {strides = array<i32>} : memref<8x128xf32, #tpu.memory_space<vmem>>, vector<8x128xf32>,
    return
  }
  func.func @transform_0(%arg0: i32) -> (i32, i32) {
    %c0_i32 = arith.constant 0 : i32
    %c0_i32_0 = arith.constant 0 : i32
    return %arg0, %c0_i32 : i32, i32
  }
  func.func @transform_1(%arg0: i32) -> (i32, i32, i32) {
    %c0_i32 = arith.constant 0 : i32
    %c0_i32_0 = arith.constant 0 : i32
    %c0_i32_1 = arith.constant 0 : i32
    %c0_i32_2 = arith.constant 0 : i32
    return %c0_i32, %c0_i32_0, %c0_i32_1 : i32, i32, i32
  }
  func.func @transform_2(%arg0: i32) -> (i32, i32, i32) {
    %c0_i32 = arith.constant 0 : i32
    %c0_i32_0 = arith.constant 0 : i32
    %c0_i32_1 = arith.constant 0 : i32
    %c0_i32_2 = arith.constant 0 : i32
    return %c0_i32, %c0_i32_0, %c0_i32_1 : i32, i32, i32
  }
  func.func @transform_3(%arg0: i32) -> (i32, i32) {
    %c0_i32 = arith.constant 0 : i32
    %c0_i32_0 = arith.constant 0 : i32
    return %arg0, %c0_i32 : i32, i32
  }
}

</mosaic_0001>

<bundles_post_ra>
// kernel: _forward_jit.1
= control target key start
LH: loop header
LB: loop body
LE: loop exit
PB: predicated region body
PF: predicated region fallthrough
CT: control target
= control target key end

     0   :  { %8 = vsyncpa [#allocation3], 0  ;;  %s644_s0 = inlined_call_operand.vmem [shape: f32[8,128], index: 0, kind: input, shape index: {}]   ;;  %s645_s1 = inlined_call_operand.hbm [shape: f32[3,128,128], index: 1, kind: input, shape index: {}]   ;;  %s646_s2 = inlined_call_operand.vmem [shape: f32[3,1,128], index: 2, kind: input, shape index: {}]   ;;  %s647_s3 = inlined_call_operand.hbm [shape: f32[8,128], index: 3, kind: output, shape index: {}]  }
   0x1   :  { %9 = vsyncpa [#allocation4], 0  ;;  %s546_s12 = smov [#allocation2]  }
   0x2   :  { %s17_s13 = sshll.u32 %s546_s12, 4  ;;  %s18_s13 = int_to_ptr.vmem [resolvable:$true] %s17_s13 }
   0x3   :  { %s510_s14 = scalar_lea.vmem %s18_s13, 6144  ;;  %p515_p1 = scmp.lt.s32.totalorder %s18_s13, %s18_s13 }
   0x4   :  { %p511_p0 = scmp.ne.s32.totalorder %s18_s13, %s510_s14  ;;  %p516_p2 = scmp.lt.s32.totalorder %s510_s14, %s510_s14 }
   0x6   :  { %p517_p3 = por %p516_p2, %p515_p1 }
   0x8   :  { %p518_p4 = pnand %p517_p3, %p511_p0 }
   0xa   :  { %521 = shalt.err (!%p518_p4)
}
   0xb   :  { %s547_s15 = smov 128   ;;  %s548_s16 = smov 8  }
   0xc   :  { %23 = dma.hbm_to_vmem [thread:$0]  %s645_s1, 6144, %s18_s13, [#allocation3], %s547_s15, %s547_s15, %s548_s16  }
   0xd   :  { %542 = dma.done.wait [#allocation3], 6144  }
   0xe   :  { %543 = vsyncadd [#allocation3], 4294961152  ;;  %v549_v0 = vmov 0.0   ;;  %vm550_vm0 = vmmov 0   ;;  %v45_v1 = vld [vmem:[#allocation2 + $0x78] sm:$0xff]  ;;  %v44_v2 = vld [vmem:[#allocation2 + $0x70] sm:$0xff] }
   0xf   :  { %387 = vmatprep.subr.mxu0 %v549_v0  ;;  %419 = vmatprep.mubr.msk.f32.mxu0 %vm550_vm0, %v549_v0  ;;  %v43_v3 = vld [vmem:[#allocation2 + $0x68] sm:$0xff]  ;;  %v42_v4 = vld [vmem:[#allocation2 + $0x60] sm:$0xff]  ;;  %v140_v5 = vld [vmem:[#allocation2 + $0xf8] sm:$0xff]  ;;  %s551_s25 = smov [#allocation5]  }
  0x10   :  { %422 = vmatprep.subr.mxu1 %v549_v0  ;;  %454 = vmatprep.mubr.msk.f32.mxu1 %vm550_vm0, %v549_v0  ;;  %v41_v6 = vld [vmem:[#allocation2 + $0x58] sm:$0xff]  ;;  %v139_v7 = vld [vmem:[#allocation2 + $0xf0] sm:$0xff]  ;;  %v138_v8 = vld [vmem:[#allocation2 + $0xe8] sm:$0xff]  ;;  %s322_s26 = sshll.u32 %s551_s25, 4  ;;  %s323_s26 = int_to_ptr.vmem [resolvable:$true] %s322_s26 }
  0x11   :  { %388 = vmatpush3.msra.mxu0 %v45_v1  ;;  %423 = vmatpush3.msra.mxu1 %v140_v5  ;;  %v40_v9 = vld [vmem:[#allocation2 + $0x50] sm:$0xff]  ;;  %v137_v10 = vld [vmem:[#allocation2 + $0xe0] sm:$0xff]  ;;  %v39_v11 = vld [vmem:[#allocation2 + $0x48] sm:$0xff]  ;;  %s522_s27 = scalar_lea.vmem %s323_s26, 128  ;;  %p527_p6 = scmp.lt.s32.totalorder %s323_s26, %s323_s26 }
  0x12   :  { %389 = vmatprep.subr.mxu0 %v549_v0  ;;  %424 = vmatprep.subr.mxu1 %v549_v0  ;;  %v136_v12 = vld [vmem:[#allocation2 + $0xd8] sm:$0xff]  ;;  %v38_v13 = vld [vmem:[#allocation2 + $0x40] sm:$0xff]  ;;  %v135_v14 = vld [vmem:[#allocation2 + $0xd0] sm:$0xff]  ;;  %p523_p5 = scmp.ne.s32.totalorder %s323_s26, %s522_s27  ;;  %p528_p7 = scmp.lt.s32.totalorder %s522_s27, %s522_s27 }
  0x13   :  { %390 = vmatpush3.msra.mxu0 %v44_v2  ;;  %425 = vmatpush3.msra.mxu1 %v139_v7  ;;  %v37_v15 = vld [vmem:[#allocation2 + $0x38] sm:$0xff]  ;;  %v134_v16 = vld [vmem:[#allocation2 + $0xc8] sm:$0xff]  ;;  %v36_v17 = vld [vmem:[#allocation2 + $0x30] sm:$0xff] }
  0x14   :  { %391 = vmatprep.subr.mxu0 %v549_v0  ;;  %426 = vmatprep.subr.mxu1 %v549_v0  ;;  %v35_v18 = vld [vmem:[#allocation2 + $0x28] sm:$0xff]  ;;  %v34_v19 = vld [vmem:[#allocation2 + $0x20] sm:$0xff]  ;;  %v33_v20 = vld [vmem:[#allocation2 + $0x18] sm:$0xff]  ;;  %p529_p8 = por %p528_p7, %p527_p6 }
  0x15   :  { %392 = vmatpush3.msra.mxu0 %v43_v3  ;;  %427 = vmatpush3.msra.mxu1 %v138_v8  ;;  %v32_v21 = vld [vmem:[#allocation2 + $0x10] sm:$0xff]  ;;  %v31_v22 = vld [vmem:[#allocation2 + $0x8] sm:$0xff]  ;;  %v30_v23 = vld [vmem:[#allocation2] sm:$0xff] }
  0x16   :  { %393 = vmatprep.subr.mxu0 %v549_v0  ;;  %428 = vmatprep.subr.mxu1 %v549_v0  ;;  %v29_v24 = vld [vmem:[%s644_s0] sm:$0xff]  ;;  %v132_v26 = vld [vmem:[#allocation2 + $0xb8] sm:$0xff]  ;;  %v131_v27 = vld [vmem:[#allocation2 + $0xb0] sm:$0xff]  ;;  %p530_p9 = pnand %p529_p8, %p523_p5 }
  0x17   :  { %394 = vmatpush3.msra.mxu0 %v42_v4  ;;  %429 = vmatpush3.msra.mxu1 %v137_v10  ;;  %v133_v25 = vld [vmem:[#allocation2 + $0xc0] sm:$0xff]  ;;  %v130_v28 = vld [vmem:[#allocation2 + $0xa8] sm:$0xff]  ;;  %v128_v30 = vld [vmem:[#allocation2 + $0x98] sm:$0xff] }
  0x18   :  { %395 = vmatprep.subr.mxu0 %v549_v0  ;;  %430 = vmatprep.subr.mxu1 %v549_v0  ;;  %v129_v29 = vld [vmem:[#allocation2 + $0xa0] sm:$0xff]  ;;  %v127_v31 = vld [vmem:[#allocation2 + $0x90] sm:$0xff]  ;;  %v126_v32 = vld [vmem:[#allocation2 + $0x88] sm:$0xff] }
  0x19   :  { %396 = vmatpush3.msra.mxu0 %v41_v6  ;;  %431 = vmatpush3.msra.mxu1 %v136_v12  ;;  %v125_v33 = vld [vmem:[#allocation2 + $0x80] sm:$0xff]  ;;  %v236_v34 = vld [vmem:[#allocation2 + $0x178] sm:$0xff]  ;;  %v235_v35 = vld [vmem:[#allocation2 + $0x170] sm:$0xff] }
  0x1a   :  { %397 = vmatprep.subr.mxu0 %v549_v0  ;;  %432 = vmatprep.subr.mxu1 %v549_v0  ;;  %v234_v36 = vld [vmem:[#allocation2 + $0x168] sm:$0xff]  ;;  %v233_v37 = vld [vmem:[#allocation2 + $0x160] sm:$0xff]  ;;  %v232_v38 = vld [vmem:[#allocation2 + $0x158] sm:$0xff] }
  0x1b   :  { %398 = vmatpush3.msra.mxu0 %v40_v9  ;;  %433 = vmatpush3.msra.mxu1 %v135_v14  ;;  %v231_v39 = vld [vmem:[#allocation2 + $0x150] sm:$0xff]  ;;  %v230_v40 = vld [vmem:[#allocation2 + $0x148] sm:$0xff]  ;;  %v331_v41 = vld [vmem:[%s646_s2] ss:$0 sm:$0xff] }
  0x1c   :  { %399 = vmatprep.subr.mxu0 %v549_v0  ;;  %434 = vmatprep.subr.mxu1 %v549_v0  ;;  %v229_v46 = vld [vmem:[#allocation2 + $0x140] sm:$0xff]  ;;  %v228_v47 = vld [vmem:[#allocation2 + $0x138] sm:$0xff]  ;;  %v227_v48 = vld [vmem:[#allocation2 + $0x130] sm:$0xff] }
  0x1d   :  { %400 = vmatpush3.msra.mxu0 %v39_v11  ;;  %435 = vmatpush3.msra.mxu1 %v134_v16  ;;  %v226_v49 = vld [vmem:[#allocation2 + $0x128] sm:$0xff]  ;;  %v225_v50 = vld [vmem:[#allocation2 + $0x120] sm:$0xff]  ;;  %v224_v51 = vld [vmem:[#allocation2 + $0x118] sm:$0xff] }
  0x1e   :  { %401 = vmatprep.subr.mxu0 %v549_v0  ;;  %436 = vmatprep.subr.mxu1 %v549_v0  ;;  %v223_v52 = vld [vmem:[#allocation2 + $0x110] sm:$0xff]  ;;  %v222_v53 = vld [vmem:[#allocation2 + $0x108] sm:$0xff]  ;;  %v221_v54 = vld [vmem:[#allocation2 + $0x100] sm:$0xff] }
  0x1f   :  { %402 = vmatpush3.msra.mxu0 %v38_v13  ;;  %437 = vmatpush3.msra.mxu1 %v133_v25  ;;  %v333_v55 = vld [vmem:[%s646_s2 + $0x1] ss:$0 sm:$0xff]  ;;  %v335_v60 = vld [vmem:[%s646_s2 + $0x2] ss:$0 sm:$0xff] }
  0x20   :  { %403 = vmatprep.subr.mxu0 %v549_v0  ;;  %438 = vmatprep.subr.mxu1 %v549_v0 }
  0x21   :  { %404 = vmatpush3.msra.mxu0 %v37_v15  ;;  %439 = vmatpush3.msra.mxu1 %v132_v26 }
  0x22   :  { %405 = vmatprep.subr.mxu0 %v549_v0  ;;  %440 = vmatprep.subr.mxu1 %v549_v0 }
  0x23   :  { %406 = vmatpush3.msra.mxu0 %v36_v17  ;;  %441 = vmatpush3.msra.mxu1 %v131_v27 }
  0x24   :  { %407 = vmatprep.subr.mxu0 %v549_v0  ;;  %442 = vmatprep.subr.mxu1 %v549_v0 }
  0x25   :  { %408 = vmatpush3.msra.mxu0 %v35_v18  ;;  %443 = vmatpush3.msra.mxu1 %v130_v28 }
  0x26   :  { %409 = vmatprep.subr.mxu0 %v549_v0  ;;  %444 = vmatprep.subr.mxu1 %v549_v0 }
  0x27   :  { %410 = vmatpush3.msra.mxu0 %v34_v19  ;;  %445 = vmatpush3.msra.mxu1 %v129_v29 }
  0x28   :  { %411 = vmatprep.subr.mxu0 %v549_v0  ;;  %446 = vmatprep.subr.mxu1 %v549_v0 }
  0x29   :  { %412 = vmatpush3.msra.mxu0 %v33_v20  ;;  %447 = vmatpush3.msra.mxu1 %v128_v30 }
  0x2a   :  { %413 = vmatprep.subr.mxu0 %v549_v0  ;;  %448 = vmatprep.subr.mxu1 %v549_v0 }
  0x2b   :  { %414 = vmatpush3.msra.mxu0 %v32_v21  ;;  %449 = vmatpush3.msra.mxu1 %v127_v31 }
  0x2c   :  { %415 = vmatprep.subr.mxu0 %v549_v0  ;;  %450 = vmatprep.subr.mxu1 %v549_v0 }
  0x2d   :  { %416 = vmatpush3.msra.mxu0 %v31_v22  ;;  %451 = vmatpush3.msra.mxu1 %v126_v32 }
  0x2e   :  { %417 = vmatprep.subr.mxu0 %v549_v0  ;;  %452 = vmatprep.subr.mxu1 %v549_v0 }
  0x2f   :  { %418 = vmatpush3.msra.mxu0 %v30_v23  ;;  %453 = vmatpush3.msra.mxu1 %v125_v33 }
  0x30   :  { %420 = vmatmul.mubr.f32.vlgmr.msra.gmra.mxu0 %v29_v24  ;;  %457 = vmatprep.subr.mxu0 %v549_v0 }
  0x31   :  { %489 = vmatprep.mubr.msk.f32.mxu0 %vm550_vm0, %v549_v0  ;;  %458 = vmatpush3.msra.mxu0 %v236_v34 }
  0x32   :  { %459 = vmatprep.subr.mxu0 %v549_v0 }
  0x33   :  { %460 = vmatpush3.msra.mxu0 %v235_v35 }
  0x34   :  { %461 = vmatprep.subr.mxu0 %v549_v0 }
  0x35   :  { %462 = vmatpush3.msra.mxu0 %v234_v36 }
  0x36   :  { %463 = vmatprep.subr.mxu0 %v549_v0 }
  0x37   :  { %464 = vmatpush3.msra.mxu0 %v233_v37 }
  0x38   :  { %465 = vmatprep.subr.mxu0 %v549_v0 }
  0x39   :  { %466 = vmatpush3.msra.mxu0 %v232_v38 }
  0x3a   :  { %467 = vmatprep.subr.mxu0 %v549_v0 }
  0x3b   :  { %468 = vmatpush3.msra.mxu0 %v231_v39 }
  0x3c   :  { %469 = vmatprep.subr.mxu0 %v549_v0 }
  0x3d   :  { %470 = vmatpush3.msra.mxu0 %v230_v40 }
  0x3e   :  { %471 = vmatprep.subr.mxu0 %v549_v0 }
  0x3f   :  { %472 = vmatpush3.msra.mxu0 %v229_v46 }
  0x40   :  { %473 = vmatprep.subr.mxu0 %v549_v0 }
  0x41   :  { %474 = vmatpush3.msra.mxu0 %v228_v47 }
  0x42   :  { %475 = vmatprep.subr.mxu0 %v549_v0 }
  0x43   :  { %476 = vmatpush3.msra.mxu0 %v227_v48 }
  0x44   :  { %477 = vmatprep.subr.mxu0 %v549_v0 }
  0x45   :  { %478 = vmatpush3.msra.mxu0 %v226_v49 }
  0x46   :  { %479 = vmatprep.subr.mxu0 %v549_v0 }
  0x47   :  { %480 = vmatpush3.msra.mxu0 %v225_v50 }
  0x48   :  { %481 = vmatprep.subr.mxu0 %v549_v0 }
  0x49   :  { %482 = vmatpush3.msra.mxu0 %v224_v51 }
  0x4a   :  { %483 = vmatprep.subr.mxu0 %v549_v0 }
  0x4b   :  { %484 = vmatpush3.msra.mxu0 %v223_v52 }
  0x4c   :  { %485 = vmatprep.subr.mxu0 %v549_v0 }
  0x4d   :  { %486 = vmatpush3.msra.mxu0 %v222_v53 }
  0x4e   :  { %487 = vmatprep.subr.mxu0 %v549_v0 }
  0x4f   :  { %488 = vmatpush3.msra.mxu0 %v221_v54 }
  0xf0   :  { %v119_v42 = vpop.f32.mrf.mxu0 }
  0xf1   :  { %v120_v43 = vadd.f32 %v331_v41, %v119_v42 }
  0xf2   :  { %v421_v44 = vpop.f32.mrf.mxu0 }
  0xf3   :  { %498 = vtanh.f32 %v120_v43 }
 0x100   :  { %v499_v45 = vpop.eup %498 }
 0x101   :  { %455 = vmatmul.mubr.f32.vlgmr.msra.gmra.mxu1 %v499_v45 }
 0x1c1   :  { %v215_v56 = vpop.f32.mrf.mxu1 }
 0x1c2   :  { %v216_v57 = vadd.f32 %v333_v55, %v215_v56 }
 0x1c3   :  { %v456_v58 = vpop.f32.mrf.mxu1 }
 0x1c4   :  { %500 = vtanh.f32 %v216_v57 }
 0x1d1   :  { %v501_v59 = vpop.eup %500 }
 0x1d2   :  { %490 = vmatmul.mubr.f32.vlgmr.msra.gmra.mxu0 %v501_v59 }
 0x292   :  { %v311_v61 = vpop.f32.mrf.mxu0 }
 0x293   :  { %v312_v62 = vadd.f32 %v335_v60, %v311_v61 }
 0x294   :  { %v491_v63 = vpop.f32.mrf.mxu0 }
 0x295   :  { %315 = vst [vmem:[#allocation5] sm:$0xff] %v312_v62 }
 0x296   :  { %533 = shalt.err (!%p530_p9)
}
 0x297   :  { %325 = dma.vmem_to_hbm [thread:$0]  %s323_s26, 128, %s647_s3, [#allocation4]  }
 0x298   :  { %544 = dma.done.wait [#allocation4], 128  }
 0x299   :  { %545 = vsyncadd [#allocation4], 4294967168 }
 0x29a   :  { %329 = vsyncpa [#allocation3], 1 }
 0x29b   :  { %330 = vsyncpa [#allocation4], 1 }

</bundles_post_ra>
